<compile_context>
chip_gen: v7x
topology: tpu7x:2x2x1
jax: 0.10.0
libtpu: 0.0.40
codegen_flags: <defaults>
</compile_context>

<pallas_src>
import jax
import jax.numpy as jnp
from jax import lax
from jax.experimental import pallas as pl
from jax.experimental.pallas import tpu as pltpu


def _round_up(x, m):
    return (x + m - 1) // m * m


def _make_fused_basic_block_kernel(H, W, C, CP, PADL, Bt):
    """relu(bn2(conv2(relu(bn1(conv1(x))))) + x), all in (C, H*W) layout.

    CP   = C rounded up to 8 (sublane-aligned channel groups in the im2col slab)
    PADL = halo/alignment pad on each side of the flattened image (multiple of
           128 lanes, >= W+1) so tap reads that fall outside the image land on
           zeros and the image store into the scratch is lane-aligned.
    Bt   = images processed per grid step (one wider matmul per conv).
    """
    HW = H * W

    def kernel(x_ref, w1_ref, b1_ref, w2_ref, b2_ref, out_ref,
               pad_ref, slab_ref):
        # Horizontal validity masks, (1, HW), broadcast over channels.
        col = lax.broadcasted_iota(jnp.int32, (1, HW), 1) % W
        left_ok = col > 0            # source valid when tap shift dw == -1
        right_ok = col < (W - 1)     # source valid when tap shift dw == +1

        # Zero only the halo columns; the data region is overwritten each conv.
        halo = jnp.zeros((Bt, C, PADL), jnp.float32)
        pad_ref[:, :, :PADL] = halo
        pad_ref[:, :, PADL + HW:] = halo
        # Zero only the (CP - C) filler rows of each tap group (their weight
        # columns are zero, but stale VMEM could hold NaN/Inf bit patterns).
        if CP != C:
            fill = jnp.zeros((CP - C, Bt * HW), slab_ref.dtype)
            for t in range(9):
                slab_ref[t * CP + C:(t + 1) * CP, :] = fill

        def conv3x3_bias(get_img, w_ref, bias):
            # Stage the (already on-chip) image(s) into the zero-haloed copy.
            for b in range(Bt):
                pad_ref[b, :, PADL:PADL + HW] = get_img(b)
            # Build the im2col slab: 9 shifted taps per image, bf16 stores.
            t = 0
            for dh in (-1, 0, 1):
                for dw in (-1, 0, 1):
                    s = PADL + dh * W + dw               # static lane offset
                    for b in range(Bt):
                        tap = pad_ref[b, :, s:s + HW]    # (C, HW)
                        if dw == -1:
                            tap = jnp.where(left_ok, tap, 0.0)
                        elif dw == 1:
                            tap = jnp.where(right_ok, tap, 0.0)
                        slab_ref[t * CP:t * CP + C,
                                 b * HW:(b + 1) * HW] = tap.astype(
                                     slab_ref.dtype)
                    t += 1
            # Single bf16 im2col matmul on the MXU, f32 accumulate:
            #   (C, 9*CP) @ (9*CP, Bt*HW).
            acc = jnp.dot(w_ref[...], slab_ref[...],
                          preferred_element_type=jnp.float32)
            return acc + bias        # BN scale already folded into the weights

        h = conv3x3_bias(lambda b: x_ref[b].astype(jnp.float32),
                         w1_ref, b1_ref[...])
        h = jnp.maximum(h, 0.0)                                   # ReLU
        y = conv3x3_bias(lambda b: h[:, b * HW:(b + 1) * HW],
                         w2_ref, b2_ref[...])
        # Residual add: re-read the VMEM-resident input block (no live value
        # held across both convs), then final ReLU and store.
        for b in range(Bt):
            out_ref[b] = jnp.maximum(
                y[:, b * HW:(b + 1) * HW] + x_ref[b].astype(jnp.float32),
                0.0).astype(out_ref.dtype)

    return kernel


def _fold_bn(gamma, beta, mean, var, eps=1e-5):
    scale = gamma / jnp.sqrt(var + eps)
    bias = beta - mean * scale
    return scale, bias


def _pack_conv3x3_weight(w_oihw, cin_padded, out_scale=None,
                         dtype=jnp.bfloat16):
    """OIHW (Cout, Cin, 3, 3) -> (Cout, 9*cin_padded) im2col weight matrix,
    with the folded BN scale multiplied into the output-channel rows."""
    cout, cin, kh, kw = w_oihw.shape
    w = w_oihw
    if out_scale is not None:
        w = w * out_scale[:, None, None, None]
    w = jnp.transpose(w, (0, 2, 3, 1))                   # (Cout, 3, 3, Cin)
    w = jnp.pad(w, ((0, 0), (0, 0), (0, 0), (0, cin_padded - cin)))
    return w.reshape(cout, kh * kw * cin_padded).astype(dtype)


def _vmem_capacity_bytes():
    try:
        info = pltpu.get_tpu_info()
        for attr in ("vmem_capacity_bytes", "vmem_bytes", "vmem_size_bytes"):
            v = getattr(info, attr, None)
            if v:
                return int(v)
    except Exception:
        pass
    return 64 * 1024 * 1024      # conservative fallback (v7x per-core size)


def _footprint_bytes(Bt, C, HW, CP, PADL):
    f32, bf16 = 4, 2
    io_blocks = 2 * 2 * Bt * C * HW * f32            # in + out, double-buffered
    weights = 2 * 2 * C * 9 * CP * bf16              # w1 + w2, double-buffered
    biases = 2 * 2 * C * f32
    scratch = Bt * C * (HW + 2 * PADL) * f32 + 9 * CP * Bt * HW * bf16
    return io_blocks + weights + biases + scratch


def _choose_batch_tile(N, C, HW, CP, PADL, vmem_cap):
    """Largest divisor of N that fits comfortably in VMEM, keeps >=2 grid
    steps (megacore / pipelining), and widens the matmul for small H*W."""
    budget = int(0.4 * vmem_cap)
    best = 1
    for bt in range(1, N + 1):
        if N % bt:
            continue
        if N >= 2 and N // bt < 2:
            continue
        if bt * HW > 16384:          # wide enough; no further benefit
            break
        if _footprint_bytes(bt, C, HW, CP, PADL) > budget:
            break
        best = bt
    return best


def basic_block_forward(x_nchw, params, *, batch_tile=None):
    """BasicBlock forward (stride=1, dilation=(1,1), downsample=None,
    residual=True) -- matches the PyTorch module in eval mode."""
    N, C, H, W = x_nchw.shape
    HW = H * W
    planes = params["conv1_w"].shape[0]
    if planes != C or params["conv2_w"].shape[0] != planes:
        raise ValueError("residual BasicBlock without downsample requires "
                         "inplanes == planes")

    CP = _round_up(C, 8)             # sublane-aligned channel group in slab
    PADL = _round_up(W + 1, 128)     # lane-aligned halo for the padded image

    s1, b1 = _fold_bn(params["bn1_gamma"], params["bn1_beta"],
                      params["bn1_mean"], params["bn1_var"])
    s2, b2 = _fold_bn(params["bn2_gamma"], params["bn2_beta"],
                      params["bn2_mean"], params["bn2_var"])
    w1 = _pack_conv3x3_weight(params["conv1_w"], CP, s1)     # bf16, scale in
    w2 = _pack_conv3x3_weight(params["conv2_w"], CP, s2)
    b1 = b1.reshape(C, 1).astype(jnp.float32)
    b2 = b2.reshape(C, 1).astype(jnp.float32)

    vmem_cap = _vmem_capacity_bytes()
    if batch_tile is None:
        Bt = _choose_batch_tile(N, C, HW, CP, PADL, vmem_cap)
    else:
        Bt = int(batch_tile)
        if N % Bt:
            raise ValueError("batch_tile must divide the batch size")

    x2d = x_nchw.reshape(N, C, HW)          # metadata-only reshape (free)
    kernel = _make_fused_basic_block_kernel(H, W, C, CP, PADL, Bt)

    vmem_limit = int(1.3 * _footprint_bytes(Bt, C, HW, CP, PADL))
    vmem_limit = min(max(vmem_limit, 16 * 1024 * 1024), int(0.75 * vmem_cap))

    out2d = pl.pallas_call(
        kernel,
        out_shape=jax.ShapeDtypeStruct((N, C, HW), x_nchw.dtype),
        grid=(N // Bt,),
        in_specs=[
            pl.BlockSpec((Bt, C, HW), lambda n: (n, 0, 0)),   # x (per step)
            pl.BlockSpec((C, 9 * CP), lambda n: (0, 0)),      # w1 (im2col*s1)
            pl.BlockSpec((C, 1), lambda n: (0, 0)),           # bn1 bias
            pl.BlockSpec((C, 9 * CP), lambda n: (0, 0)),      # w2 (im2col*s2)
            pl.BlockSpec((C, 1), lambda n: (0, 0)),           # bn2 bias
        ],
        out_specs=pl.BlockSpec((Bt, C, HW), lambda n: (n, 0, 0)),
        scratch_shapes=[
            pltpu.VMEM((Bt, C, HW + 2 * PADL), jnp.float32),  # padded images
            pltpu.VMEM((9 * CP, Bt * HW), jnp.bfloat16),      # im2col slab
        ],
        compiler_params=pltpu.CompilerParams(
            dimension_semantics=("parallel",),
            vmem_limit_bytes=vmem_limit),
    )(x2d, w1, b1, w2, b2)

    return out2d.reshape(N, C, H, W)


def _reference_forward(x_nchw, params):
    """Pure-JAX reference (lax convs, f32) for verification."""
    def conv(x, w):
        return lax.conv_general_dilated(
            x, w, window_strides=(1, 1), padding="SAME",
            dimension_numbers=("NCHW", "OIHW", "NCHW"))

    s1, b1 = _fold_bn(params["bn1_gamma"], params["bn1_beta"],
                      params["bn1_mean"], params["bn1_var"])
    s2, b2 = _fold_bn(params["bn2_gamma"], params["bn2_beta"],
                      params["bn2_mean"], params["bn2_var"])
    out = conv(x_nchw, params["conv1_w"])
    out = out * s1[None, :, None, None] + b1[None, :, None, None]
    out = jnp.maximum(out, 0.0)
    out = conv(out, params["conv2_w"])
    out = out * s2[None, :, None, None] + b2[None, :, None, None]
    out = out + x_nchw
    return jnp.maximum(out, 0.0)


def init_params(key, inplanes, planes):
    ks = jax.random.split(key, 6)
    fan1 = inplanes * 9
    fan2 = planes * 9
    return {
        "conv1_w": jax.random.normal(ks[0], (planes, inplanes, 3, 3),
                                     jnp.float32) / jnp.sqrt(fan1),
        "conv2_w": jax.random.normal(ks[1], (planes, planes, 3, 3),
                                     jnp.float32) / jnp.sqrt(fan2),
        "bn1_gamma": 1.0 + 0.1 * jax.random.normal(ks[2], (planes,), jnp.float32),
        "bn1_beta": 0.1 * jax.random.normal(ks[3], (planes,), jnp.float32),
        "bn1_mean": 0.05 * jnp.arange(planes, dtype=jnp.float32),
        "bn1_var": 1.0 + 0.02 * jnp.arange(planes, dtype=jnp.float32),
        "bn2_gamma": 1.0 + 0.1 * jax.random.normal(ks[4], (planes,), jnp.float32),
        "bn2_beta": 0.1 * jax.random.normal(ks[5], (planes,), jnp.float32),
        "bn2_mean": 0.03 * jnp.arange(planes, dtype=jnp.float32),
        "bn2_var": 1.0 + 0.01 * jnp.arange(planes, dtype=jnp.float32),
    }


if __name__ == "__main__":
    key = jax.random.PRNGKey(0)
    k_x, k_p = jax.random.split(key)

    N, C, H, W = 2, 4, 16, 16  # inplanes == planes (residual add requires it)
    x = jax.random.normal(k_x, (N, C, H, W), jnp.float32)
    params = init_params(k_p, inplanes=C, planes=C)

    out = jax.block_until_ready(jax.jit(basic_block_forward)(x, params))
    ref = _reference_forward(x, params)
    assert out.shape == (N, C, H, W)
    max_err = float(jnp.max(jnp.abs(out - ref)))
    # bf16 matmul path -> slightly looser tolerance than pure f32.
    assert jnp.allclose(out, ref, atol=5e-2, rtol=5e-2), max_err

    # Also exercise the multi-image-per-step path (Bt = 2).
    x4 = jax.random.normal(jax.random.PRNGKey(1), (4, C, H, W), jnp.float32)
    out4 = jax.block_until_ready(
        jax.jit(lambda a, p: basic_block_forward(a, p, batch_tile=2))(x4, params))
    ref4 = _reference_forward(x4, params)
    max_err4 = float(jnp.max(jnp.abs(out4 - ref4)))
    assert jnp.allclose(out4, ref4, atol=5e-2, rtol=5e-2), max_err4

    print("KERNEL_OK")
</pallas_src>

<mosaic_0001>
module attributes {stable_mosaic.version = 11 : i64} {
  func.func @kernel(%arg0: i32, %arg1: memref<1x4x256xf32, #tpu.memory_space<vmem>>, %arg2: memref<4x72xbf16, #tpu.memory_space<vmem>>, %arg3: memref<4x1xf32, #tpu.memory_space<vmem>>, %arg4: memref<4x72xbf16, #tpu.memory_space<vmem>>, %arg5: memref<4x1xf32, #tpu.memory_space<vmem>>, %arg6: memref<1x4x256xf32, #tpu.memory_space<vmem>>, %arg7: memref<1x4x512xf32, #tpu.memory_space<vmem>>, %arg8: memref<72x256xbf16, #tpu.memory_space<vmem>>) attributes {dimension_semantics = [#tpu.dimension_semantics<parallel>], iteration_bounds = array<i64: 2>, scalar_prefetch = 0 : i64, scratch_operands = 2 : i64, tpu.core_type = #tpu.core_type<tc>, window_params = [{transform_indices = @transform_0, window_bounds = array<i64: 1, 4, 256>}, {pipeline_mode = #tpu.pipeline_mode<synchronous>, transform_indices = @transform_1, window_bounds = array<i64: 4, 72>}, {pipeline_mode = #tpu.pipeline_mode<synchronous>, transform_indices = @transform_2, window_bounds = array<i64: 4, 1>}, {pipeline_mode = #tpu.pipeline_mode<synchronous>, transform_indices = @transform_3, window_bounds = array<i64: 4, 72>}, {pipeline_mode = #tpu.pipeline_mode<synchronous>, transform_indices = @transform_4, window_bounds = array<i64: 4, 1>}, {transform_indices = @transform_5, window_bounds = array<i64: 1, 4, 256>}]} {
    %0 = tpu.iota {dimensions = array<i32: 1>} : vector<1x256xi32>
    %c16_i32 = arith.constant 16 : i32
    %c0_i32 = arith.constant 0 : i32
    %1 = arith.cmpi eq, %c16_i32, %c0_i32 : i32
    %c1_i32 = arith.constant 1 : i32
    %2 = arith.select %1, %c1_i32, %c16_i32 : i32
    %3 = vector.broadcast %2 : i32 to vector<1x256xi32>
    %4 = arith.remsi %0, %3 : vector<1x256xi32>
    %c0_i32_0 = arith.constant 0 : i32
    %5 = vector.broadcast %c0_i32_0 : i32 to vector<1x256xi32>
    %6 = arith.cmpi ne, %4, %5 : vector<1x256xi32>
    %c0_i32_1 = arith.constant 0 : i32
    %7 = vector.broadcast %c0_i32_1 : i32 to vector<1x256xi32>
    %8 = arith.cmpi slt, %4, %7 : vector<1x256xi32>
    %c0_i32_2 = arith.constant 0 : i32
    %9 = arith.cmpi slt, %2, %c0_i32_2 : i32
    %10 = vector.broadcast %9 : i1 to vector<1x256xi1>
    %11 = vector.broadcast %10 : vector<1x256xi1> to vector<1x256xi1>
    %12 = arith.xori %8, %11 : vector<1x256xi1>
    %13 = arith.andi %12, %6 : vector<1x256xi1>
    %14 = vector.broadcast %2 : i32 to vector<1x256xi32>
    %15 = arith.addi %4, %14 : vector<1x256xi32>
    %16 = arith.select %13, %15, %4 : vector<1x256xi1>, vector<1x256xi32>
    %c0_i32_3 = arith.constant 0 : i32
    %17 = vector.broadcast %c0_i32_3 : i32 to vector<1x256xi32>
    %18 = arith.cmpi sgt, %16, %17 : vector<1x256xi32>
    %c15_i32 = arith.constant 15 : i32
    %19 = vector.broadcast %c15_i32 : i32 to vector<1x256xi32>
    %20 = arith.cmpi slt, %16, %19 : vector<1x256xi32>
    %cst = arith.constant 0.000000e+00 : f32
    %21 = vector.broadcast %cst : f32 to vector<1x4x128xf32>
    %c0 = arith.constant 0 : index
    %c0_4 = arith.constant 0 : index
    %c0_5 = arith.constant 0 : index
    %22 = vector.load %arg7[%c0, %c0_4, %c0_5] : memref<1x4x512xf32, #tpu.memory_space<vmem>>, vector<1x4x128xf32>
    tpu.vector_store %arg7[%c0, %c0_4, %c0_5], %21 {strides = array<i32>} : memref<1x4x512xf32, #tpu.memory_space<vmem>>, vector<1x4x128xf32>,
    %c0_6 = arith.constant 0 : index
    %c0_7 = arith.constant 0 : index
    %c384 = arith.constant 384 : index
    %23 = vector.load %arg7[%c0_6, %c0_7, %c384] : memref<1x4x512xf32, #tpu.memory_space<vmem>>, vector<1x4x128xf32>
    tpu.vector_store %arg7[%c0_6, %c0_7, %c384], %21 {strides = array<i32>} : memref<1x4x512xf32, #tpu.memory_space<vmem>>, vector<1x4x128xf32>,
    %cst_8 = arith.constant 0.000000e+00 : bf16
    %24 = vector.broadcast %cst_8 : bf16 to vector<4x256xbf16>
    %c4 = arith.constant 4 : index
    %c0_9 = arith.constant 0 : index
    %25 = vector.load %arg8[%c4, %c0_9] : memref<72x256xbf16, #tpu.memory_space<vmem>>, vector<4x256xbf16>
    tpu.vector_store %arg8[%c4, %c0_9], %24 {strides = array<i32>} : memref<72x256xbf16, #tpu.memory_space<vmem>>, vector<4x256xbf16>,
    %c12 = arith.constant 12 : index
    %c0_10 = arith.constant 0 : index
    %26 = vector.load %arg8[%c12, %c0_10] : memref<72x256xbf16, #tpu.memory_space<vmem>>, vector<4x256xbf16>
    tpu.vector_store %arg8[%c12, %c0_10], %24 {strides = array<i32>} : memref<72x256xbf16, #tpu.memory_space<vmem>>, vector<4x256xbf16>,
    %c20 = arith.constant 20 : index
    %c0_11 = arith.constant 0 : index
    %27 = vector.load %arg8[%c20, %c0_11] : memref<72x256xbf16, #tpu.memory_space<vmem>>, vector<4x256xbf16>
    tpu.vector_store %arg8[%c20, %c0_11], %24 {strides = array<i32>} : memref<72x256xbf16, #tpu.memory_space<vmem>>, vector<4x256xbf16>,
    %c28 = arith.constant 28 : index
    %c0_12 = arith.constant 0 : index
    %28 = vector.load %arg8[%c28, %c0_12] : memref<72x256xbf16, #tpu.memory_space<vmem>>, vector<4x256xbf16>
    tpu.vector_store %arg8[%c28, %c0_12], %24 {strides = array<i32>} : memref<72x256xbf16, #tpu.memory_space<vmem>>, vector<4x256xbf16>,
    %c36 = arith.constant 36 : index
    %c0_13 = arith.constant 0 : index
    %29 = vector.load %arg8[%c36, %c0_13] : memref<72x256xbf16, #tpu.memory_space<vmem>>, vector<4x256xbf16>
    tpu.vector_store %arg8[%c36, %c0_13], %24 {strides = array<i32>} : memref<72x256xbf16, #tpu.memory_space<vmem>>, vector<4x256xbf16>,
    %c44 = arith.constant 44 : index
    %c0_14 = arith.constant 0 : index
    %30 = vector.load %arg8[%c44, %c0_14] : memref<72x256xbf16, #tpu.memory_space<vmem>>, vector<4x256xbf16>
    tpu.vector_store %arg8[%c44, %c0_14], %24 {strides = array<i32>} : memref<72x256xbf16, #tpu.memory_space<vmem>>, vector<4x256xbf16>,
    %c52 = arith.constant 52 : index
    %c0_15 = arith.constant 0 : index
    %31 = vector.load %arg8[%c52, %c0_15] : memref<72x256xbf16, #tpu.memory_space<vmem>>, vector<4x256xbf16>
    tpu.vector_store %arg8[%c52, %c0_15], %24 {strides = array<i32>} : memref<72x256xbf16, #tpu.memory_space<vmem>>, vector<4x256xbf16>,
    %c60 = arith.constant 60 : index
    %c0_16 = arith.constant 0 : index
    %32 = vector.load %arg8[%c60, %c0_16] : memref<72x256xbf16, #tpu.memory_space<vmem>>, vector<4x256xbf16>
    tpu.vector_store %arg8[%c60, %c0_16], %24 {strides = array<i32>} : memref<72x256xbf16, #tpu.memory_space<vmem>>, vector<4x256xbf16>,
    %c68 = arith.constant 68 : index
    %c0_17 = arith.constant 0 : index
    %33 = vector.load %arg8[%c68, %c0_17] : memref<72x256xbf16, #tpu.memory_space<vmem>>, vector<4x256xbf16>
    tpu.vector_store %arg8[%c68, %c0_17], %24 {strides = array<i32>} : memref<72x256xbf16, #tpu.memory_space<vmem>>, vector<4x256xbf16>,
    %c0_18 = arith.constant 0 : index
    %c0_19 = arith.constant 0 : index
    %34 = vector.load %arg3[%c0_18, %c0_19] : memref<4x1xf32, #tpu.memory_space<vmem>>, vector<4x1xf32>
    %c0_20 = arith.constant 0 : index
    %c0_21 = arith.constant 0 : index
    %c0_22 = arith.constant 0 : index
    %35 = vector.load %arg1[%c0_20, %c0_21, %c0_22] : memref<1x4x256xf32, #tpu.memory_space<vmem>>, vector<1x4x256xf32>
    %36 = vector.shape_cast %35 : vector<1x4x256xf32> to vector<4x256xf32>
    %c0_23 = arith.constant 0 : index
    %c0_24 = arith.constant 0 : index
    %c128 = arith.constant 128 : index
    %37 = vector.load %arg7[%c0_23, %c0_24, %c128] : memref<1x4x512xf32, #tpu.memory_space<vmem>>, vector<1x4x256xf32>
    %38 = vector.shape_cast %37 : vector<1x4x256xf32> to vector<4x256xf32>
    %39 = vector.shape_cast %36 : vector<4x256xf32> to vector<1x4x256xf32>
    tpu.vector_store %arg7[%c0_23, %c0_24, %c128], %39 {strides = array<i32>} : memref<1x4x512xf32, #tpu.memory_space<vmem>>, vector<1x4x256xf32>,
    %c0_25 = arith.constant 0 : index
    %c0_26 = arith.constant 0 : index
    %c111 = arith.constant 111 : index
    %40 = vector.load %arg7[%c0_25, %c0_26, %c111] : memref<1x4x512xf32, #tpu.memory_space<vmem>>, vector<1x4x256xf32>
    %41 = vector.shape_cast %40 : vector<1x4x256xf32> to vector<4x256xf32>
    %cst_27 = arith.constant 0.000000e+00 : f32
    %42 = vector.shape_cast %18 : vector<1x256xi1> to vector<1x256xi1>
    %43 = vector.broadcast %42 : vector<1x256xi1> to vector<4x256xi1>
    %44 = vector.broadcast %cst_27 : f32 to vector<4x256xf32>
    %45 = arith.select %43, %41, %44 : vector<4x256xi1>, vector<4x256xf32>
    %46 = arith.truncf %45 : vector<4x256xf32> to vector<4x256xbf16>
    %c0_28 = arith.constant 0 : index
    %c0_29 = arith.constant 0 : index
    %47 = vector.load %arg8[%c0_28, %c0_29] : memref<72x256xbf16, #tpu.memory_space<vmem>>, vector<4x256xbf16>
    tpu.vector_store %arg8[%c0_28, %c0_29], %46 {strides = array<i32>} : memref<72x256xbf16, #tpu.memory_space<vmem>>, vector<4x256xbf16>,
    %c0_30 = arith.constant 0 : index
    %c0_31 = arith.constant 0 : index
    %c112 = arith.constant 112 : index
    %48 = vector.load %arg7[%c0_30, %c0_31, %c112] : memref<1x4x512xf32, #tpu.memory_space<vmem>>, vector<1x4x256xf32>
    %49 = vector.shape_cast %48 : vector<1x4x256xf32> to vector<4x256xf32>
    %50 = arith.truncf %49 : vector<4x256xf32> to vector<4x256xbf16>
    %c8 = arith.constant 8 : index
    %c0_32 = arith.constant 0 : index
    %51 = vector.load %arg8[%c8, %c0_32] : memref<72x256xbf16, #tpu.memory_space<vmem>>, vector<4x256xbf16>
    tpu.vector_store %arg8[%c8, %c0_32], %50 {strides = array<i32>} : memref<72x256xbf16, #tpu.memory_space<vmem>>, vector<4x256xbf16>,
    %c0_33 = arith.constant 0 : index
    %c0_34 = arith.constant 0 : index
    %c113 = arith.constant 113 : index
    %52 = vector.load %arg7[%c0_33, %c0_34, %c113] : memref<1x4x512xf32, #tpu.memory_space<vmem>>, vector<1x4x256xf32>
    %53 = vector.shape_cast %52 : vector<1x4x256xf32> to vector<4x256xf32>
    %cst_35 = arith.constant 0.000000e+00 : f32
    %54 = vector.shape_cast %20 : vector<1x256xi1> to vector<1x256xi1>
    %55 = vector.broadcast %54 : vector<1x256xi1> to vector<4x256xi1>
    %56 = vector.broadcast %cst_35 : f32 to vector<4x256xf32>
    %57 = arith.select %55, %53, %56 : vector<4x256xi1>, vector<4x256xf32>
    %58 = arith.truncf %57 : vector<4x256xf32> to vector<4x256xbf16>
    %c16 = arith.constant 16 : index
    %c0_36 = arith.constant 0 : index
    %59 = vector.load %arg8[%c16, %c0_36] : memref<72x256xbf16, #tpu.memory_space<vmem>>, vector<4x256xbf16>
    tpu.vector_store %arg8[%c16, %c0_36], %58 {strides = array<i32>} : memref<72x256xbf16, #tpu.memory_space<vmem>>, vector<4x256xbf16>,
    %c0_37 = arith.constant 0 : index
    %c0_38 = arith.constant 0 : index
    %c127 = arith.constant 127 : index
    %60 = vector.load %arg7[%c0_37, %c0_38, %c127] : memref<1x4x512xf32, #tpu.memory_space<vmem>>, vector<1x4x256xf32>
    %61 = vector.shape_cast %60 : vector<1x4x256xf32> to vector<4x256xf32>
    %cst_39 = arith.constant 0.000000e+00 : f32
    %62 = vector.shape_cast %18 : vector<1x256xi1> to vector<1x256xi1>
    %63 = vector.broadcast %62 : vector<1x256xi1> to vector<4x256xi1>
    %64 = vector.broadcast %cst_39 : f32 to vector<4x256xf32>
    %65 = arith.select %63, %61, %64 : vector<4x256xi1>, vector<4x256xf32>
    %66 = arith.truncf %65 : vector<4x256xf32> to vector<4x256xbf16>
    %c24 = arith.constant 24 : index
    %c0_40 = arith.constant 0 : index
    %67 = vector.load %arg8[%c24, %c0_40] : memref<72x256xbf16, #tpu.memory_space<vmem>>, vector<4x256xbf16>
    tpu.vector_store %arg8[%c24, %c0_40], %66 {strides = array<i32>} : memref<72x256xbf16, #tpu.memory_space<vmem>>, vector<4x256xbf16>,
    %c0_41 = arith.constant 0 : index
    %c0_42 = arith.constant 0 : index
    %c128_43 = arith.constant 128 : index
    %68 = vector.load %arg7[%c0_41, %c0_42, %c128_43] : memref<1x4x512xf32, #tpu.memory_space<vmem>>, vector<1x4x256xf32>
    %69 = vector.shape_cast %68 : vector<1x4x256xf32> to vector<4x256xf32>
    %70 = arith.truncf %69 : vector<4x256xf32> to vector<4x256xbf16>
    %c32 = arith.constant 32 : index
    %c0_44 = arith.constant 0 : index
    %71 = vector.load %arg8[%c32, %c0_44] : memref<72x256xbf16, #tpu.memory_space<vmem>>, vector<4x256xbf16>
    tpu.vector_store %arg8[%c32, %c0_44], %70 {strides = array<i32>} : memref<72x256xbf16, #tpu.memory_space<vmem>>, vector<4x256xbf16>,
    %c0_45 = arith.constant 0 : index
    %c0_46 = arith.constant 0 : index
    %c129 = arith.constant 129 : index
    %72 = vector.load %arg7[%c0_45, %c0_46, %c129] : memref<1x4x512xf32, #tpu.memory_space<vmem>>, vector<1x4x256xf32>
    %73 = vector.shape_cast %72 : vector<1x4x256xf32> to vector<4x256xf32>
    %cst_47 = arith.constant 0.000000e+00 : f32
    %74 = vector.shape_cast %20 : vector<1x256xi1> to vector<1x256xi1>
    %75 = vector.broadcast %74 : vector<1x256xi1> to vector<4x256xi1>
    %76 = vector.broadcast %cst_47 : f32 to vector<4x256xf32>
    %77 = arith.select %75, %73, %76 : vector<4x256xi1>, vector<4x256xf32>
    %78 = arith.truncf %77 : vector<4x256xf32> to vector<4x256xbf16>
    %c40 = arith.constant 40 : index
    %c0_48 = arith.constant 0 : index
    %79 = vector.load %arg8[%c40, %c0_48] : memref<72x256xbf16, #tpu.memory_space<vmem>>, vector<4x256xbf16>
    tpu.vector_store %arg8[%c40, %c0_48], %78 {strides = array<i32>} : memref<72x256xbf16, #tpu.memory_space<vmem>>, vector<4x256xbf16>,
    %c0_49 = arith.constant 0 : index
    %c0_50 = arith.constant 0 : index
    %c143 = arith.constant 143 : index
    %80 = vector.load %arg7[%c0_49, %c0_50, %c143] : memref<1x4x512xf32, #tpu.memory_space<vmem>>, vector<1x4x256xf32>
    %81 = vector.shape_cast %80 : vector<1x4x256xf32> to vector<4x256xf32>
    %cst_51 = arith.constant 0.000000e+00 : f32
    %82 = vector.shape_cast %18 : vector<1x256xi1> to vector<1x256xi1>
    %83 = vector.broadcast %82 : vector<1x256xi1> to vector<4x256xi1>
    %84 = vector.broadcast %cst_51 : f32 to vector<4x256xf32>
    %85 = arith.select %83, %81, %84 : vector<4x256xi1>, vector<4x256xf32>
    %86 = arith.truncf %85 : vector<4x256xf32> to vector<4x256xbf16>
    %c48 = arith.constant 48 : index
    %c0_52 = arith.constant 0 : index
    %87 = vector.load %arg8[%c48, %c0_52] : memref<72x256xbf16, #tpu.memory_space<vmem>>, vector<4x256xbf16>
    tpu.vector_store %arg8[%c48, %c0_52], %86 {strides = array<i32>} : memref<72x256xbf16, #tpu.memory_space<vmem>>, vector<4x256xbf16>,
    %c0_53 = arith.constant 0 : index
    %c0_54 = arith.constant 0 : index
    %c144 = arith.constant 144 : index
    %88 = vector.load %arg7[%c0_53, %c0_54, %c144] : memref<1x4x512xf32, #tpu.memory_space<vmem>>, vector<1x4x256xf32>
    %89 = vector.shape_cast %88 : vector<1x4x256xf32> to vector<4x256xf32>
    %90 = arith.truncf %89 : vector<4x256xf32> to vector<4x256xbf16>
    %c56 = arith.constant 56 : index
    %c0_55 = arith.constant 0 : index
    %91 = vector.load %arg8[%c56, %c0_55] : memref<72x256xbf16, #tpu.memory_space<vmem>>, vector<4x256xbf16>
    tpu.vector_store %arg8[%c56, %c0_55], %90 {strides = array<i32>} : memref<72x256xbf16, #tpu.memory_space<vmem>>, vector<4x256xbf16>,
    %c0_56 = arith.constant 0 : index
    %c0_57 = arith.constant 0 : index
    %c145 = arith.constant 145 : index
    %92 = vector.load %arg7[%c0_56, %c0_57, %c145] : memref<1x4x512xf32, #tpu.memory_space<vmem>>, vector<1x4x256xf32>
    %93 = vector.shape_cast %92 : vector<1x4x256xf32> to vector<4x256xf32>
    %cst_58 = arith.constant 0.000000e+00 : f32
    %94 = vector.shape_cast %20 : vector<1x256xi1> to vector<1x256xi1>
    %95 = vector.broadcast %94 : vector<1x256xi1> to vector<4x256xi1>
    %96 = vector.broadcast %cst_58 : f32 to vector<4x256xf32>
    %97 = arith.select %95, %93, %96 : vector<4x256xi1>, vector<4x256xf32>
    %98 = arith.truncf %97 : vector<4x256xf32> to vector<4x256xbf16>
    %c64 = arith.constant 64 : index
    %c0_59 = arith.constant 0 : index
    %99 = vector.load %arg8[%c64, %c0_59] : memref<72x256xbf16, #tpu.memory_space<vmem>>, vector<4x256xbf16>
    tpu.vector_store %arg8[%c64, %c0_59], %98 {strides = array<i32>} : memref<72x256xbf16, #tpu.memory_space<vmem>>, vector<4x256xbf16>,
    %c0_60 = arith.constant 0 : index
    %c0_61 = arith.constant 0 : index
    %100 = vector.load %arg2[%c0_60, %c0_61] : memref<4x72xbf16, #tpu.memory_space<vmem>>, vector<4x72xbf16>
    %c0_62 = arith.constant 0 : index
    %c0_63 = arith.constant 0 : index
    %101 = vector.load %arg8[%c0_62, %c0_63] : memref<72x256xbf16, #tpu.memory_space<vmem>>, vector<72x256xbf16>
    %cst_64 = arith.constant dense<0.000000e+00> : vector<4x256xf32>
    %102 = tpu.matmul %100, %101, %cst_64 {dimension_numbers = #tpu.dot_dimension_numbers<[1], [0], [0], [1], [0, 0, 1, 1], [], []>} : vector<4x72xbf16>, vector<72x256xbf16>, vector<4x256xf32> -> vector<4x256xf32>
    %103 = vector.broadcast %34 : vector<4x1xf32> to vector<4x256xf32>
    %104 = arith.addf %102, %103 : vector<4x256xf32>
    %cst_65 = arith.constant 0.000000e+00 : f32
    %105 = vector.broadcast %cst_65 : f32 to vector<4x256xf32>
    %106 = arith.maximumf %104, %105 : vector<4x256xf32>
    %c0_66 = arith.constant 0 : index
    %c0_67 = arith.constant 0 : index
    %107 = vector.load %arg5[%c0_66, %c0_67] : memref<4x1xf32, #tpu.memory_space<vmem>>, vector<4x1xf32>
    %c0_68 = arith.constant 0 : index
    %c0_69 = arith.constant 0 : index
    %c128_70 = arith.constant 128 : index
    %108 = vector.load %arg7[%c0_68, %c0_69, %c128_70] : memref<1x4x512xf32, #tpu.memory_space<vmem>>, vector<1x4x256xf32>
    %109 = vector.shape_cast %108 : vector<1x4x256xf32> to vector<4x256xf32>
    %110 = vector.shape_cast %106 : vector<4x256xf32> to vector<1x4x256xf32>
    tpu.vector_store %arg7[%c0_68, %c0_69, %c128_70], %110 {strides = array<i32>} : memref<1x4x512xf32, #tpu.memory_space<vmem>>, vector<1x4x256xf32>,
    %c0_71 = arith.constant 0 : index
    %c0_72 = arith.constant 0 : index
    %c111_73 = arith.constant 111 : index
    %111 = vector.load %arg7[%c0_71, %c0_72, %c111_73] : memref<1x4x512xf32, #tpu.memory_space<vmem>>, vector<1x4x256xf32>
    %112 = vector.shape_cast %111 : vector<1x4x256xf32> to vector<4x256xf32>
    %cst_74 = arith.constant 0.000000e+00 : f32
    %113 = vector.shape_cast %18 : vector<1x256xi1> to vector<1x256xi1>
    %114 = vector.broadcast %113 : vector<1x256xi1> to vector<4x256xi1>
    %115 = vector.broadcast %cst_74 : f32 to vector<4x256xf32>
    %116 = arith.select %114, %112, %115 : vector<4x256xi1>, vector<4x256xf32>
    %117 = arith.truncf %116 : vector<4x256xf32> to vector<4x256xbf16>
    %c0_75 = arith.constant 0 : index
    %c0_76 = arith.constant 0 : index
    %118 = vector.load %arg8[%c0_75, %c0_76] : memref<72x256xbf16, #tpu.memory_space<vmem>>, vector<4x256xbf16>
    tpu.vector_store %arg8[%c0_75, %c0_76], %117 {strides = array<i32>} : memref<72x256xbf16, #tpu.memory_space<vmem>>, vector<4x256xbf16>,
    %c0_77 = arith.constant 0 : index
    %c0_78 = arith.constant 0 : index
    %c112_79 = arith.constant 112 : index
    %119 = vector.load %arg7[%c0_77, %c0_78, %c112_79] : memref<1x4x512xf32, #tpu.memory_space<vmem>>, vector<1x4x256xf32>
    %120 = vector.shape_cast %119 : vector<1x4x256xf32> to vector<4x256xf32>
    %121 = arith.truncf %120 : vector<4x256xf32> to vector<4x256xbf16>
    %c8_80 = arith.constant 8 : index
    %c0_81 = arith.constant 0 : index
    %122 = vector.load %arg8[%c8_80, %c0_81] : memref<72x256xbf16, #tpu.memory_space<vmem>>, vector<4x256xbf16>
    tpu.vector_store %arg8[%c8_80, %c0_81], %121 {strides = array<i32>} : memref<72x256xbf16, #tpu.memory_space<vmem>>, vector<4x256xbf16>,
    %c0_82 = arith.constant 0 : index
    %c0_83 = arith.constant 0 : index
    %c113_84 = arith.constant 113 : index
    %123 = vector.load %arg7[%c0_82, %c0_83, %c113_84] : memref<1x4x512xf32, #tpu.memory_space<vmem>>, vector<1x4x256xf32>
    %124 = vector.shape_cast %123 : vector<1x4x256xf32> to vector<4x256xf32>
    %cst_85 = arith.constant 0.000000e+00 : f32
    %125 = vector.shape_cast %20 : vector<1x256xi1> to vector<1x256xi1>
    %126 = vector.broadcast %125 : vector<1x256xi1> to vector<4x256xi1>
    %127 = vector.broadcast %cst_85 : f32 to vector<4x256xf32>
    %128 = arith.select %126, %124, %127 : vector<4x256xi1>, vector<4x256xf32>
    %129 = arith.truncf %128 : vector<4x256xf32> to vector<4x256xbf16>
    %c16_86 = arith.constant 16 : index
    %c0_87 = arith.constant 0 : index
    %130 = vector.load %arg8[%c16_86, %c0_87] : memref<72x256xbf16, #tpu.memory_space<vmem>>, vector<4x256xbf16>
    tpu.vector_store %arg8[%c16_86, %c0_87], %129 {strides = array<i32>} : memref<72x256xbf16, #tpu.memory_space<vmem>>, vector<4x256xbf16>,
    %c0_88 = arith.constant 0 : index
    %c0_89 = arith.constant 0 : index
    %c127_90 = arith.constant 127 : index
    %131 = vector.load %arg7[%c0_88, %c0_89, %c127_90] : memref<1x4x512xf32, #tpu.memory_space<vmem>>, vector<1x4x256xf32>
    %132 = vector.shape_cast %131 : vector<1x4x256xf32> to vector<4x256xf32>
    %cst_91 = arith.constant 0.000000e+00 : f32
    %133 = vector.shape_cast %18 : vector<1x256xi1> to vector<1x256xi1>
    %134 = vector.broadcast %133 : vector<1x256xi1> to vector<4x256xi1>
    %135 = vector.broadcast %cst_91 : f32 to vector<4x256xf32>
    %136 = arith.select %134, %132, %135 : vector<4x256xi1>, vector<4x256xf32>
    %137 = arith.truncf %136 : vector<4x256xf32> to vector<4x256xbf16>
    %c24_92 = arith.constant 24 : index
    %c0_93 = arith.constant 0 : index
    %138 = vector.load %arg8[%c24_92, %c0_93] : memref<72x256xbf16, #tpu.memory_space<vmem>>, vector<4x256xbf16>
    tpu.vector_store %arg8[%c24_92, %c0_93], %137 {strides = array<i32>} : memref<72x256xbf16, #tpu.memory_space<vmem>>, vector<4x256xbf16>,
    %c0_94 = arith.constant 0 : index
    %c0_95 = arith.constant 0 : index
    %c128_96 = arith.constant 128 : index
    %139 = vector.load %arg7[%c0_94, %c0_95, %c128_96] : memref<1x4x512xf32, #tpu.memory_space<vmem>>, vector<1x4x256xf32>
    %140 = vector.shape_cast %139 : vector<1x4x256xf32> to vector<4x256xf32>
    %141 = arith.truncf %140 : vector<4x256xf32> to vector<4x256xbf16>
    %c32_97 = arith.constant 32 : index
    %c0_98 = arith.constant 0 : index
    %142 = vector.load %arg8[%c32_97, %c0_98] : memref<72x256xbf16, #tpu.memory_space<vmem>>, vector<4x256xbf16>
    tpu.vector_store %arg8[%c32_97, %c0_98], %141 {strides = array<i32>} : memref<72x256xbf16, #tpu.memory_space<vmem>>, vector<4x256xbf16>,
    %c0_99 = arith.constant 0 : index
    %c0_100 = arith.constant 0 : index
    %c129_101 = arith.constant 129 : index
    %143 = vector.load %arg7[%c0_99, %c0_100, %c129_101] : memref<1x4x512xf32, #tpu.memory_space<vmem>>, vector<1x4x256xf32>
    %144 = vector.shape_cast %143 : vector<1x4x256xf32> to vector<4x256xf32>
    %cst_102 = arith.constant 0.000000e+00 : f32
    %145 = vector.shape_cast %20 : vector<1x256xi1> to vector<1x256xi1>
    %146 = vector.broadcast %145 : vector<1x256xi1> to vector<4x256xi1>
    %147 = vector.broadcast %cst_102 : f32 to vector<4x256xf32>
    %148 = arith.select %146, %144, %147 : vector<4x256xi1>, vector<4x256xf32>
    %149 = arith.truncf %148 : vector<4x256xf32> to vector<4x256xbf16>
    %c40_103 = arith.constant 40 : index
    %c0_104 = arith.constant 0 : index
    %150 = vector.load %arg8[%c40_103, %c0_104] : memref<72x256xbf16, #tpu.memory_space<vmem>>, vector<4x256xbf16>
    tpu.vector_store %arg8[%c40_103, %c0_104], %149 {strides = array<i32>} : memref<72x256xbf16, #tpu.memory_space<vmem>>, vector<4x256xbf16>,
    %c0_105 = arith.constant 0 : index
    %c0_106 = arith.constant 0 : index
    %c143_107 = arith.constant 143 : index
    %151 = vector.load %arg7[%c0_105, %c0_106, %c143_107] : memref<1x4x512xf32, #tpu.memory_space<vmem>>, vector<1x4x256xf32>
    %152 = vector.shape_cast %151 : vector<1x4x256xf32> to vector<4x256xf32>
    %cst_108 = arith.constant 0.000000e+00 : f32
    %153 = vector.shape_cast %18 : vector<1x256xi1> to vector<1x256xi1>
    %154 = vector.broadcast %153 : vector<1x256xi1> to vector<4x256xi1>
    %155 = vector.broadcast %cst_108 : f32 to vector<4x256xf32>
    %156 = arith.select %154, %152, %155 : vector<4x256xi1>, vector<4x256xf32>
    %157 = arith.truncf %156 : vector<4x256xf32> to vector<4x256xbf16>
    %c48_109 = arith.constant 48 : index
    %c0_110 = arith.constant 0 : index
    %158 = vector.load %arg8[%c48_109, %c0_110] : memref<72x256xbf16, #tpu.memory_space<vmem>>, vector<4x256xbf16>
    tpu.vector_store %arg8[%c48_109, %c0_110], %157 {strides = array<i32>} : memref<72x256xbf16, #tpu.memory_space<vmem>>, vector<4x256xbf16>,
    %c0_111 = arith.constant 0 : index
    %c0_112 = arith.constant 0 : index
    %c144_113 = arith.constant 144 : index
    %159 = vector.load %arg7[%c0_111, %c0_112, %c144_113] : memref<1x4x512xf32, #tpu.memory_space<vmem>>, vector<1x4x256xf32>
    %160 = vector.shape_cast %159 : vector<1x4x256xf32> to vector<4x256xf32>
    %161 = arith.truncf %160 : vector<4x256xf32> to vector<4x256xbf16>
    %c56_114 = arith.constant 56 : index
    %c0_115 = arith.constant 0 : index
    %162 = vector.load %arg8[%c56_114, %c0_115] : memref<72x256xbf16, #tpu.memory_space<vmem>>, vector<4x256xbf16>
    tpu.vector_store %arg8[%c56_114, %c0_115], %161 {strides = array<i32>} : memref<72x256xbf16, #tpu.memory_space<vmem>>, vector<4x256xbf16>,
    %c0_116 = arith.constant 0 : index
    %c0_117 = arith.constant 0 : index
    %c145_118 = arith.constant 145 : index
    %163 = vector.load %arg7[%c0_116, %c0_117, %c145_118] : memref<1x4x512xf32, #tpu.memory_space<vmem>>, vector<1x4x256xf32>
    %164 = vector.shape_cast %163 : vector<1x4x256xf32> to vector<4x256xf32>
    %cst_119 = arith.constant 0.000000e+00 : f32
    %165 = vector.shape_cast %20 : vector<1x256xi1> to vector<1x256xi1>
    %166 = vector.broadcast %165 : vector<1x256xi1> to vector<4x256xi1>
    %167 = vector.broadcast %cst_119 : f32 to vector<4x256xf32>
    %168 = arith.select %166, %164, %167 : vector<4x256xi1>, vector<4x256xf32>
    %169 = arith.truncf %168 : vector<4x256xf32> to vector<4x256xbf16>
    %c64_120 = arith.constant 64 : index
    %c0_121 = arith.constant 0 : index
    %170 = vector.load %arg8[%c64_120, %c0_121] : memref<72x256xbf16, #tpu.memory_space<vmem>>, vector<4x256xbf16>
    tpu.vector_store %arg8[%c64_120, %c0_121], %169 {strides = array<i32>} : memref<72x256xbf16, #tpu.memory_space<vmem>>, vector<4x256xbf16>,
    %c0_122 = arith.constant 0 : index
    %c0_123 = arith.constant 0 : index
    %171 = vector.load %arg4[%c0_122, %c0_123] : memref<4x72xbf16, #tpu.memory_space<vmem>>, vector<4x72xbf16>
    %c0_124 = arith.constant 0 : index
    %c0_125 = arith.constant 0 : index
    %172 = vector.load %arg8[%c0_124, %c0_125] : memref<72x256xbf16, #tpu.memory_space<vmem>>, vector<72x256xbf16>
    %cst_126 = arith.constant dense<0.000000e+00> : vector<4x256xf32>
    %173 = tpu.matmul %171, %172, %cst_126 {dimension_numbers = #tpu.dot_dimension_numbers<[1], [0], [0], [1], [0, 0, 1, 1], [], []>} : vector<4x72xbf16>, vector<72x256xbf16>, vector<4x256xf32> -> vector<4x256xf32>
    %174 = vector.broadcast %107 : vector<4x1xf32> to vector<4x256xf32>
    %175 = arith.addf %173, %174 : vector<4x256xf32>
    %c0_127 = arith.constant 0 : index
    %c0_128 = arith.constant 0 : index
    %c0_129 = arith.constant 0 : index
    %176 = vector.load %arg1[%c0_127, %c0_128, %c0_129] : memref<1x4x256xf32, #tpu.memory_space<vmem>>, vector<1x4x256xf32>
    %177 = vector.shape_cast %176 : vector<1x4x256xf32> to vector<4x256xf32>
    %178 = arith.addf %175, %177 : vector<4x256xf32>
    %cst_130 = arith.constant 0.000000e+00 : f32
    %179 = vector.broadcast %cst_130 : f32 to vector<4x256xf32>
    %180 = arith.maximumf %178, %179 : vector<4x256xf32>
    %c0_131 = arith.constant 0 : index
    %c0_132 = arith.constant 0 : index
    %c0_133 = arith.constant 0 : index
    %181 = vector.load %arg6[%c0_131, %c0_132, %c0_133] : memref<1x4x256xf32, #tpu.memory_space<vmem>>, vector<1x4x256xf32>
    %182 = vector.shape_cast %181 : vector<1x4x256xf32> to vector<4x256xf32>
    %183 = vector.shape_cast %180 : vector<4x256xf32> to vector<1x4x256xf32>
    tpu.vector_store %arg6[%c0_131, %c0_132, %c0_133], %183 {strides = array<i32>} : memref<1x4x256xf32, #tpu.memory_space<vmem>>, vector<1x4x256xf32>,
    return
  }
  func.func @transform_0(%arg0: i32) -> (i32, i32, i32) {
    %c0_i32 = arith.constant 0 : i32
    %c0_i32_0 = arith.constant 0 : i32
    %c0_i32_1 = arith.constant 0 : i32
    return %arg0, %c0_i32, %c0_i32_0 : i32, i32, i32
  }
  func.func @transform_1(%arg0: i32) -> (i32, i32) {
    %c0_i32 = arith.constant 0 : i32
    %c0_i32_0 = arith.constant 0 : i32
    %c0_i32_1 = arith.constant 0 : i32
    return %c0_i32, %c0_i32_0 : i32, i32
  }
  func.func @transform_2(%arg0: i32) -> (i32, i32) {
    %c0_i32 = arith.constant 0 : i32
    %c0_i32_0 = arith.constant 0 : i32
    %c0_i32_1 = arith.constant 0 : i32
    return %c0_i32, %c0_i32_0 : i32, i32
  }
  func.func @transform_3(%arg0: i32) -> (i32, i32) {
    %c0_i32 = arith.constant 0 : i32
    %c0_i32_0 = arith.constant 0 : i32
    %c0_i32_1 = arith.constant 0 : i32
    return %c0_i32, %c0_i32_0 : i32, i32
  }
  func.func @transform_4(%arg0: i32) -> (i32, i32) {
    %c0_i32 = arith.constant 0 : i32
    %c0_i32_0 = arith.constant 0 : i32
    %c0_i32_1 = arith.constant 0 : i32
    return %c0_i32, %c0_i32_0 : i32, i32
  }
  func.func @transform_5(%arg0: i32) -> (i32, i32, i32) {
    %c0_i32 = arith.constant 0 : i32
    %c0_i32_0 = arith.constant 0 : i32
    %c0_i32_1 = arith.constant 0 : i32
    return %arg0, %c0_i32, %c0_i32_0 : i32, i32, i32
  }
}

</mosaic_0001>

<bundles_post_ra>
// kernel: basic_block_forward.1
= control target key start
LH: loop header
LB: loop body
LE: loop exit
PB: predicated region body
PF: predicated region fallthrough
CT: control target
= control target key end

     0   :  { %s1268_s18 = smov 0   ;;  %s1451_s0 = inlined_call_operand.vmem [shape: f32[2,4,256], index: 0, kind: input, shape index: {}]   ;;  %s1452_s1 = inlined_call_operand.vmem [shape: bf16[4,72], index: 1, kind: input, shape index: {}]   ;;  %s1453_s2 = inlined_call_operand.vmem [shape: f32[4,1], index: 2, kind: input, shape index: {}]   ;;  %s1454_s3 = inlined_call_operand.vmem [shape: bf16[4,72], index: 3, kind: input, shape index: {}]   ;;  %s1455_s4 = inlined_call_operand.vmem [shape: f32[4,1], index: 4, kind: input, shape index: {}]   ;;  %s1456_s5 = inlined_call_operand.vmem [shape: f32[2,4,256], index: 5, kind: output, shape index: {}]  }
   0x1 LB: > { %s1028_s19 = sadd.s32 4294967295, %s1226_s18   ;;  %p1032_p0 = scmp.ge.s32.totalorder %s1226_s18, 1  ;;  %s1226_s18 = sphi %s1268_s18, %s15_s18  }
   0x2   : > { %p187_p1 = scmp.lt.s32.totalorder %s1226_s18, 3 }
   0x4   : > { %p188_p2 = pnand %p1032_p0, %p187_p1 }
   0x5   : > { %p215_p3 = scmp.lt.s32.totalorder (!%p188_p2), %s1028_s19, 1  ;;  %v1228_v0 = vmov (!%p188_p2), 0.0   ;;  %v1229_v4 = vmov (!%p188_p2), 0   ;;  %s1230_s24 = smov (!%p188_p2), 15   ;;  %v268_v20 = vld [vmem:[%s1453_s2] sm:$0xf] (!%p188_p2)  ;;  %v226_v21 = vlaneseq (!%p188_p2) }
   0x6   : > { %191 = sbr.rel (%p188_p2) target bundleno = 803 (0x323), region = 40  ;;  %257 = vst [vmem:[#allocation2] sm:$0xf] (!%p188_p2), %v1228_v0  ;;  %258 = vst [vmem:[#allocation2 + $0xc] sm:$0xf] (!%p188_p2), %v1228_v0  ;;  %612 = vmatprep.mubr.bf16.mxu0 (!%p188_p2), %v1229_v4  ;;  %1157 = vset.pattern.permute.xlu0 (!%p188_p2), %v1229_v4  ;;  %s1231_s25 = smov (!%p188_p2), 17  }
   0x7   : > { %259 = vst [vmem:[#allocation3] sm:$0xcc] (!%p188_p2), %v1229_v4  ;;  %260 = vst [vmem:[#allocation3 + $0x8] sm:$0xcc] (!%p188_p2), %v1229_v4  ;;  %951 = vmatprep.mubr.bf16.mxu1 (!%p188_p2), %v1229_v4  ;;  %s1232_s26 = smov (!%p188_p2), 1   ;;  %s1233_s27 = smov (!%p188_p2), 16  }
   0x8   : > { %261 = vst [vmem:[#allocation3 + $0x10] sm:$0xcc] (!%p188_p2), %v1229_v4  ;;  %262 = vst [vmem:[#allocation3 + $0x18] sm:$0xcc] (!%p188_p2), %v1229_v4  ;;  %s1234_s28 = smov (!%p188_p2), 127   ;;  %s1235_s29 = smov (!%p188_p2), 113  }
   0x9   : > { %263 = vst [vmem:[#allocation3 + $0x20] sm:$0xcc] (!%p188_p2), %v1229_v4  ;;  %264 = vst [vmem:[#allocation3 + $0x28] sm:$0xcc] (!%p188_p2), %v1229_v4  ;;  %s1236_s30 = smov (!%p188_p2), 112   ;;  %s1237_s6 = smov (!%p188_p2), 111  }
   0xa   : > { %265 = vst [vmem:[#allocation3 + $0x30] sm:$0xcc] (!%p188_p2), %v1229_v4  ;;  %266 = vst [vmem:[#allocation3 + $0x38] sm:$0xcc] (!%p188_p2), %v1229_v4  ;;  %v227_v22 = vand.u32 (!%p188_p2), 127, %v226_v21  ;;  %vm286_vm0 = vcmask (!%p188_p2), 138240  }
   0xb   : > { %267 = vst [vmem:[#allocation3 + $0x40] sm:$0xcc] (!%p188_p2), %v1229_v4  ;;  %vm345_vm4 = vcmask (!%p188_p2), 121856   ;;  %vm324_vm6 = vcmask (!%p188_p2), 1043456   ;;  %vm326_vm7 = vcmask (!%p188_p2), 130048   ;;  %vm372_vm8 = vcmask (!%p188_p2), 7168  }
   0xc   : > { %v228_v23 = vadd.s32 (!%p188_p2), 128, %v227_v22  ;;  %v233_v26 = vand.u32 (!%p188_p2), 15, %v227_v22  ;;  %vm412_vm9 = vcmask (!%p188_p2), 1039360   ;;  %vm439_vm10 = vcmask (!%p188_p2), 924672   ;;  %v850_v42 = vld [vmem:[%s1454_s3] sm:$0x3] (!%p188_p2) }
   0xd   : > { %s1466_s19 = smov (!%p215_p3, %s1028_s19), 1  ;;  %v402_v14 = vld [vmem:[#allocation2 + $0xc] sm:$0xf]  ;;  %vm478_vm11 = vcmask 916480   ;;  %vm493_vm12 = vcmask 908288   ;;  %vm569_vm13 = vcmask 588800  }
   0xe   : > { %s1085_s20 = sshll.u32 %s1466_s19, 3  ;;  %v429_v16 = vld [vmem:[#allocation2 + $0xc] sm:$0xf]  ;;  %v240_v27 = vand.u32 15, %v228_v23  ;;  %vm1314_vm1 = vcmp.gt.s32.totalorder %v233_v26, 0  ;;  %vm1328_vm3 = vcmp.lt.s32.totalorder %v233_v26, 15 }
   0xf   : > { %s219_s23 = scalar_lea.vmem %s1451_s0, %s1085_s20  ;;  %v456_v17 = vld [vmem:[#allocation2 + $0xc] sm:$0xf]  ;;  %s224_s17 = scalar_lea.vmem %s1456_s5, %s1085_s20 }
  0x10   : > { %v1284_v1 = vld [vmem:[%s219_s23] sm:$0xff]  ;;  %v1096_v18 = vpack.c.bf16 %v456_v17, %v456_v17  ;;  %v483_v19 = vld [vmem:[#allocation2 + $0xc] sm:$0xf]  ;;  %vm1318_vm2 = vcmp.gt.s32.totalorder %v240_v27, 0  ;;  %vm1332_vm5 = vcmp.lt.s32.totalorder %v240_v27, 15 }
  0x11   : > { %270 = vst [vmem:[#allocation2 + $0x4] sm:$0xff] %v1284_v1  ;;  %v1289_v2 = vcombine.high %v1284_v1, %v1284_v1 }
  0x13   : > { %v1095_v3 = vpack.c.bf16 %v1289_v2, %v1284_v1  ;;  %v1142_v15 = vpack.i.bf16 %v1289_v2, %v1284_v1 }
  0x15   : > { %400 = vst [vmem:[#allocation3 + $0x20] sm:$0x33] %v1095_v3 }
  0x18   : > { %v331_v5 = vld [vmem:[#allocation2 + $0x8] sm:$0xf]  ;;  %v271_v7 = vld [vmem:[#allocation2] sm:$0xff] }
  0x19   : > { %v272_v6 = vld [vmem:[#allocation2 + $0x8] sm:$0xf]  ;;  %343 = vrot.lane.b32.xlu1 %v331_v5, %s1230_s24  ;;  %v279_v9 = vcombine.high %v271_v7, %v271_v7 }
  0x1a   : > { %284 = vrot.lane.b32.xlu0 %v272_v6, %s1231_s25  ;;  %v362_v8 = vld [vmem:[#allocation2 + $0x8] sm:$0xf] }
  0x1b   : > { %v303_v10 = vld [vmem:[#allocation2 + $0x8] sm:$0xf]  ;;  %v1127_v11 = vpack.i.bf16 %v279_v9, %v271_v7  ;;  %v1088_v13 = vpack.c.bf16 %v279_v9, %v271_v7 }
  0x1c   : > { %v1089_v12 = vpack.c.bf16 %v303_v10, %v303_v10 }
  0x1d   : > { %370 = vrot.lane.b32.xlu1 %v362_v8, %s1232_s26 }
  0x1e   : > { %1128 = vrot.lane.b32.xlu0 %v1127_v11, %s1231_s25 }
  0x21   : > { %320 = vrot.lane.b32.xlu1 %v1089_v12, %s1233_s27 }
  0x22   : > { %1133 = vrot.lane.b32.xlu0 %v1127_v11, %s1230_s24 }
  0x25   : > { %318 = vrot.lane.b32.xlu1 %v1088_v13, %s1233_s27 }
  0x26   : > { %1138 = vrot.lane.b32.xlu0 %v1127_v11, %s1232_s26 }
  0x29   : > { %410 = vrot.lane.b32.xlu1 %v402_v14, %s1234_s28 }
  0x2a   : > { %1143 = vrot.lane.b32.xlu0 %v1142_v15, %s1234_s28 }
  0x2d   : > { %437 = vrot.lane.b32.xlu1 %v429_v16, %s1235_s29 }
  0x2e   : > { %1148 = vrot.lane.b32.xlu0 %v1142_v15, %s1235_s29 }
  0x31   : > { %473 = vrot.lane.b32.xlu1 %v1096_v18, %s1236_s30 }
  0x32   : > { %471 = vrot.lane.b32.xlu0 %v1095_v3, %s1236_s30 }
  0x35   : > { %491 = vrot.lane.b32.xlu1 %v483_v19, %s1237_s6 }
  0x36   : > { %1153 = vrot.lane.b32.xlu0 %v1142_v15, %s1237_s6 }
  0x3a   : > { %521 = vperm.xlu0 %1157, %v268_v20  }
  0x8b   : > { %v344_v24 = vpop.permute.xlu1 %343 }
  0x8c   : > { %v285_v25 = vpop.permute.xlu0 %284 }
  0x8f   : > { %v371_v28 = vpop.permute.xlu1 %370 }
  0x90   : > { %v1129_v29 = vpop.permute.xlu0 %1128 }
  0x91   : > { %v1131_v32 = vunpack.i.h.bf16 %v1129_v29  ;;  %v1130_v33 = vunpack.i.l.bf16 %v1129_v29 }
  0x93   : > { %v288_v34 = vsel %vm286_vm0, %v1131_v32, %v285_v25  ;;  %v287_v35 = vsel %vm286_vm0, %v1130_v33, %v1131_v32  ;;  %v321_v36 = vpop.permute.xlu1 %320 }
  0x94   : > { %v292_v37 = vsel %vm1318_vm2, %v288_v34, 0.0  ;;  %v291_v38 = vsel %vm1314_vm1, %v287_v35, 0.0  ;;  %v1134_v40 = vpop.permute.xlu0 %1133  ;;  %v323_v48 = vrot.slane %v321_v36, 4 }
  0x95   : > { %v1087_v41 = vpack.c.bf16 %v292_v37, %v291_v38  ;;  %v1136_v43 = vunpack.i.h.bf16 %v1134_v40  ;;  %v1135_v44 = vunpack.i.l.bf16 %v1134_v40 }
  0x97   : > { %301 = vst [vmem:[#allocation3] sm:$0x33] %v1087_v41  ;;  %v347_v45 = vsel %vm345_vm4, %v1136_v43, %v344_v24  ;;  %v346_v46 = vsel %vm345_vm4, %v1135_v44, %v1136_v43  ;;  %v319_v47 = vpop.permute.xlu1 %318 }
  0x98   : > { %v351_v49 = vsel %vm1332_vm5, %v347_v45, 0.0  ;;  %v350_v50 = vsel %vm1328_vm3, %v346_v46, 0.0  ;;  %v322_v51 = vrot.slane %v319_v47, 4  ;;  %v1139_v52 = vpop.permute.xlu0 %1138 }
  0x99   : > { %v1090_v53 = vpack.c.bf16 %v351_v49, %v350_v50  ;;  %v1141_v54 = vunpack.i.h.bf16 %v1139_v52  ;;  %v1140_v55 = vunpack.i.l.bf16 %v1139_v52  ;;  %v509_v50 = vld [vmem:[%s1452_s1] sm:$0x3] }
  0x9a   : > { %v325_v56 = vsel %vm324_vm6, %v322_v51, %v323_v48 }
  0x9b   : > { %360 = vst [vmem:[#allocation3 + $0x10] sm:$0x33] %v1090_v53  ;;  %v327_v57 = vsel %vm326_vm7, %v319_v47, %v325_v56  ;;  %v374_v58 = vsel %vm372_vm8, %v1141_v54, %v371_v28  ;;  %v373_v59 = vsel %vm372_vm8, %v1140_v55, %v1141_v54  ;;  %v411_v60 = vpop.permute.xlu1 %410 }
  0x9c   : > { %329 = vst [vmem:[#allocation3 + $0x8] sm:$0x33] %v327_v57  ;;  %v378_v61 = vsel %vm1318_vm2, %v374_v58, 0.0  ;;  %v377_v62 = vsel %vm1314_vm1, %v373_v59, 0.0  ;;  %v1144_v63 = vpop.permute.xlu0 %1143 }
  0x9d   : > { %v1091_v0 = vpack.c.bf16 %v378_v61, %v377_v62  ;;  %v1146_v3 = vunpack.i.h.bf16 %v1144_v63  ;;  %v1145_v4 = vunpack.i.l.bf16 %v1144_v63 }
  0x9f   : > { %387 = vst [vmem:[#allocation3 + $0x18] sm:$0x33] %v1091_v0  ;;  %v414_v5 = vsel %vm412_vm9, %v1146_v3, %v411_v60  ;;  %v413_v6 = vsel %vm412_vm9, %v1145_v4, %v1146_v3  ;;  %v438_v7 = vpop.permute.xlu1 %437 }
  0xa0   : > { %v418_v8 = vsel %vm1332_vm5, %v414_v5, 0.0  ;;  %v417_v9 = vsel %vm1328_vm3, %v413_v6, 0.0  ;;  %v1149_v10 = vpop.permute.xlu0 %1148 }
  0xa1   : > { %v1093_v11 = vpack.c.bf16 %v418_v8, %v417_v9  ;;  %v1151_v12 = vunpack.i.h.bf16 %v1149_v10  ;;  %v1150_v13 = vunpack.i.l.bf16 %v1149_v10 }
  0xa3   : > { %427 = vst [vmem:[#allocation3 + $0x28] sm:$0x33] %v1093_v11  ;;  %v441_v14 = vsel %vm439_vm10, %v1151_v12, %v438_v7  ;;  %v440_v15 = vsel %vm439_vm10, %v1150_v13, %v1151_v12  ;;  %v474_v16 = vpop.permute.xlu1 %473  ;;  %v1190_v17 = vld [vmem:[#allocation3 + $0x4] ss:$8 sps:$4 sm:$0xff]   ;;  %v1192_v18 = vld [vmem:[#allocation3] ss:$8 sps:$4 sm:$0xff]  }
  0xa4   : > { %v445_v19 = vsel %vm1318_vm2, %v441_v14, 0.0  ;;  %v444_v20 = vsel %vm1314_vm1, %v440_v15, 0.0  ;;  %v476_v21 = vrot.slane %v474_v16, 4  ;;  %v472_v22 = vpop.permute.xlu0 %471  ;;  %580 = vmatprep.subr.bf16.mxu0 %v1190_v17  ;;  %v747_v11 = vld [vmem:[#allocation2 + $0xc] sm:$0xf] }
  0xa5   : > { %v1094_v23 = vpack.c.bf16 %v445_v19, %v444_v20  ;;  %v475_v24 = vrot.slane %v472_v22, 4  ;;  %581 = vmatpush1.bf16.msra.mxu0 %v1192_v18  ;;  %v773_v12 = vld [vmem:[#allocation2 + $0xc] sm:$0xf]  ;;  %v623_v15 = vld [vmem:[%s1455_s4] sm:$0xf] }
  0xa6   : > { %v1193_v25 = vld [vmem:[#allocation3 + $0x14] ss:$8 sps:$4 sm:$0xff]   ;;  %v1195_v32 = vld [vmem:[#allocation3 + $0x10] ss:$8 sps:$4 sm:$0xff]  }
  0xa7   : > { %454 = vst [vmem:[#allocation3 + $0x30] sm:$0x33] %v1094_v23  ;;  %v477_v26 = vsel %vm324_vm6, %v475_v24, %v476_v21  ;;  %582 = vmatprep.subr.bf16.mxu0 %v1193_v25  ;;  %v492_v29 = vpop.permute.xlu1 %491  ;;  %v799_v13 = vld [vmem:[#allocation2 + $0xc] sm:$0xf] }
  0xa8   : > { %v479_v27 = vsel %vm478_vm11, %v472_v22, %v477_v26  ;;  %v1154_v28 = vpop.permute.xlu0 %1153  ;;  %v1107_v14 = vpack.c.bf16 %v799_v13, %v799_v13  ;;  %v825_v16 = vld [vmem:[#allocation2 + $0xc] sm:$0xf] }
  0xa9   : > { %481 = vst [vmem:[#allocation3 + $0x38] sm:$0x33] %v479_v27  ;;  %v1156_v33 = vunpack.i.h.bf16 %v1154_v28  ;;  %v1155_v34 = vunpack.i.l.bf16 %v1154_v28  ;;  %583 = vmatpush1.bf16.msra.mxu0 %v1195_v32 }
  0xaa   : > { %v1196_v35 = vld [vmem:[#allocation3 + $0x24] ss:$8 sps:$4 sm:$0xff]   ;;  %v1198_v41 = vld [vmem:[#allocation3 + $0x20] ss:$8 sps:$4 sm:$0xff]  }
  0xab   : > { %v494_v36 = vsel %vm493_vm12, %v1155_v34, %v1156_v33  ;;  %v495_v37 = vsel %vm493_vm12, %v1156_v33, %v492_v29  ;;  %584 = vmatprep.subr.bf16.mxu0 %v1196_v35 }
  0xac   : > { %v498_v38 = vsel %vm1328_vm3, %v494_v36, 0.0  ;;  %v499_v40 = vsel %vm1332_vm5, %v495_v37, 0.0 }
  0xad   : > { %v1097_v43 = vpack.c.bf16 %v499_v40, %v498_v38  ;;  %585 = vmatpush1.bf16.msra.mxu0 %v1198_v41 }
  0xaf   : > { %508 = vst [vmem:[#allocation3 + $0x40] sm:$0x33] %v1097_v43 }
  0xb0   : > { %v1199_v44 = vld [vmem:[#allocation3 + $0x34] ss:$8 sps:$4 sm:$0xff]   ;;  %v1201_v45 = vld [vmem:[#allocation3 + $0x30] ss:$8 sps:$4 sm:$0xff]  }
  0xb1   : > { %586 = vmatprep.subr.bf16.mxu0 %v1199_v44 }
  0xb2   : > { %587 = vmatpush1.bf16.msra.mxu0 %v1201_v45 }
  0xb6   : > { %v518_v46 = vld [vmem:[#allocation3 + $0x40] sm:$0xff] }
  0xb7   : > { %v1057_v47 = vcombine.high %v518_v46, %v518_v46  ;;  %v1056_v48 = vcombine.low %v518_v46, %v518_v46 }
  0xb9   : > { %1058 = vmatprep.subr.msk.bf16.mxu0 %vm324_vm6, %v1057_v47  ;;  %v575_v49 = vsel %vm324_vm6, %v1056_v48, 0  ;;  %v522_v51 = vpop.permute.xlu0 %521 }
  0xba   : > { %589 = vmatpush1.bf16.msra.mxu0 %v575_v49 }
  0xbd   : > { %1059 = vmatmul.mubr.msk.bf16.vlgmr.msra.gmra.mrb[0].mxu0 %vm569_vm13, %v509_v50 }
 0x190   : > { %v614_v52 = vpop.f32.mrb[0].mxu0 }
 0x191   : > { %v615_v53 = vadd.f32 %v614_v52, %v522_v51  ;;  %v616_v54 = vpop.f32.mrb[1].mxu0 }
 0x192   : > { %v617_v55 = vadd.f32 %v616_v54, %v522_v51  ;;  %v618_v56 = vpop.f32.mrb[2].mxu0 }
 0x193   : > { %v621_v57 = vmax.f32 %v615_v53, 0.0  ;;  %v619_v58 = vpop.f32.mrb[3].mxu0 }
 0x194   : > { %v622_v59 = vmax.f32 %v617_v55, 0.0 }
 0x196   : > { %v626_v60 = vcombine.low %v621_v57, %v622_v59  ;;  %v1219_v61 = vcombine.low %v622_v59, %v622_v59 }
 0x198   : > { %628 = vst [vmem:[#allocation2 + $0x4] sm:$0xff] %v626_v60  ;;  %v1106_v62 = vpack.c.bf16 %v1219_v61, %v626_v60  ;;  %v1173_v9 = vpack.i.bf16 %v1219_v61, %v626_v60 }
 0x19a   : > { %745 = vst [vmem:[#allocation3 + $0x20] sm:$0x33] %v1106_v62 }
 0x19f   : > { %v630_v63 = vld [vmem:[#allocation2 + $0x8] sm:$0xf]  ;;  %v681_v0 = vld [vmem:[#allocation2] sm:$0xff] }
 0x1a0   : > { %638 = vrot.lane.b32.xlu1 %v630_v63, %s1231_s25  ;;  %v685_v3 = vcombine.high %v681_v0, %v681_v0  ;;  %v682_v5 = vld [vmem:[#allocation2 + $0x8] sm:$0xf] }
 0x1a1   : > { %v708_v6 = vld [vmem:[#allocation2 + $0x8] sm:$0xf] }
 0x1a2   : > { %v1163_v4 = vpack.i.bf16 %v685_v3, %v681_v0  ;;  %v1099_v7 = vpack.c.bf16 %v685_v3, %v681_v0  ;;  %v656_v8 = vld [vmem:[#allocation2 + $0x8] sm:$0xf] }
 0x1a3   : > { %v1100_v10 = vpack.c.bf16 %v656_v8, %v656_v8 }
 0x1a4   : > { %1164 = vrot.lane.b32.xlu0 %v1163_v4, %s1230_s24  ;;  %690 = vrot.lane.b32.xlu1 %v682_v5, %s1230_s24 }
 0x1a8   : > { %1169 = vrot.lane.b32.xlu0 %v1163_v4, %s1232_s26  ;;  %716 = vrot.lane.b32.xlu1 %v708_v6, %s1232_s26 }
 0x1ac   : > { %671 = vrot.lane.b32.xlu0 %v1099_v7, %s1233_s27  ;;  %1159 = vrot.lane.b32.xlu1 %v1163_v4, %s1231_s25 }
 0x1b0   : > { %1174 = vrot.lane.b32.xlu0 %v1173_v9, %s1234_s28  ;;  %673 = vrot.lane.b32.xlu1 %v1100_v10, %s1233_s27 }
 0x1b4   : > { %1179 = vrot.lane.b32.xlu0 %v1173_v9, %s1235_s29  ;;  %755 = vrot.lane.b32.xlu1 %v747_v11, %s1234_s28 }
 0x1b8   : > { %814 = vrot.lane.b32.xlu0 %v1106_v62, %s1236_s30  ;;  %781 = vrot.lane.b32.xlu1 %v773_v12, %s1235_s29 }
 0x1bc   : > { %1184 = vrot.lane.b32.xlu0 %v1173_v9, %s1237_s6  ;;  %816 = vrot.lane.b32.xlu1 %v1107_v14, %s1236_s30 }
 0x1c0   : > { %862 = vperm.xlu0 %1157, %v623_v15   ;;  %833 = vrot.lane.b32.xlu1 %v825_v16, %s1237_s6 }
 0x212   : > { %v639_v17 = vpop.permute.xlu1 %638 }
 0x216   : > { %v1165_v18 = vpop.permute.xlu0 %1164  ;;  %v691_v19 = vpop.permute.xlu1 %690 }
 0x217   : > { %v1167_v20 = vunpack.i.h.bf16 %v1165_v18  ;;  %v1166_v21 = vunpack.i.l.bf16 %v1165_v18 }
 0x219   : > { %v692_v22 = vsel %vm345_vm4, %v1166_v21, %v1167_v20  ;;  %v693_v23 = vsel %vm345_vm4, %v1167_v20, %v691_v19 }
 0x21a   : > { %v696_v24 = vsel %vm1328_vm3, %v692_v22, 0.0  ;;  %v697_v25 = vsel %vm1332_vm5, %v693_v23, 0.0  ;;  %v1170_v26 = vpop.permute.xlu0 %1169  ;;  %v717_v27 = vpop.permute.xlu1 %716 }
 0x21b   : > { %v1101_v28 = vpack.c.bf16 %v697_v25, %v696_v24  ;;  %v1172_v29 = vunpack.i.h.bf16 %v1170_v26  ;;  %v1171_v32 = vunpack.i.l.bf16 %v1170_v26 }
 0x21d   : > { %706 = vst [vmem:[#allocation3 + $0x10] sm:$0x33] %v1101_v28  ;;  %v718_v33 = vsel %vm372_vm8, %v1171_v32, %v1172_v29  ;;  %v719_v34 = vsel %vm372_vm8, %v1172_v29, %v717_v27 }
 0x21e   : > { %v722_v35 = vsel %vm1314_vm1, %v718_v33, 0.0  ;;  %v723_v36 = vsel %vm1318_vm2, %v719_v34, 0.0  ;;  %v672_v37 = vpop.permute.xlu0 %671  ;;  %v1160_v38 = vpop.permute.xlu1 %1159 }
 0x21f   : > { %v1102_v40 = vpack.c.bf16 %v723_v36, %v722_v35  ;;  %v1162_v41 = vunpack.i.h.bf16 %v1160_v38  ;;  %v1161_v43 = vunpack.i.l.bf16 %v1160_v38  ;;  %v675_v46 = vrot.slane %v672_v37, 4 }
 0x221   : > { %732 = vst [vmem:[#allocation3 + $0x18] sm:$0x33] %v1102_v40  ;;  %v641_v44 = vsel %vm286_vm0, %v1162_v41, %v639_v17  ;;  %v640_v45 = vsel %vm286_vm0, %v1161_v43, %v1162_v41 }
 0x222   : > { %v645_v47 = vsel %vm1318_vm2, %v641_v44, 0.0  ;;  %v644_v48 = vsel %vm1314_vm1, %v640_v45, 0.0  ;;  %v1175_v49 = vpop.permute.xlu0 %1174  ;;  %v674_v50 = vpop.permute.xlu1 %673 }
 0x223   : > { %v1098_v51 = vpack.c.bf16 %v645_v47, %v644_v48  ;;  %v1177_v52 = vunpack.i.h.bf16 %v1175_v49  ;;  %v1176_v53 = vunpack.i.l.bf16 %v1175_v49  ;;  %v676_v54 = vrot.slane %v674_v50, 4 }
 0x225   : > { %654 = vst [vmem:[#allocation3] sm:$0x33] %v1098_v51  ;;  %v677_v55 = vsel %vm324_vm6, %v675_v46, %v676_v54  ;;  %v757_v56 = vsel %vm412_vm9, %v1176_v53, %v1177_v52 }
 0x226   : > { %v678_v57 = vsel %vm326_vm7, %v672_v37, %v677_v55  ;;  %v1180_v58 = vpop.permute.xlu0 %1179  ;;  %v756_v59 = vpop.permute.xlu1 %755  ;;  %v761_v63 = vsel %vm1328_vm3, %v757_v56, 0.0 }
 0x227   : > { %680 = vst [vmem:[#allocation3 + $0x8] sm:$0x33] %v678_v57  ;;  %v1182_v60 = vunpack.i.h.bf16 %v1180_v58  ;;  %v1181_v61 = vunpack.i.l.bf16 %v1180_v58  ;;  %v758_v62 = vsel %vm412_vm9, %v1177_v52, %v756_v59 }
 0x228   : > { %v762_v0 = vsel %vm1332_vm5, %v758_v62, 0.0  ;;  %v1208_v19 = vld [vmem:[#allocation3 + $0x14] ss:$8 sps:$4 sm:$0xff]   ;;  %v1210_v23 = vld [vmem:[#allocation3 + $0x10] ss:$8 sps:$4 sm:$0xff]  }
 0x229   : > { %v1104_v3 = vpack.c.bf16 %v762_v0, %v761_v63  ;;  %v783_v4 = vsel %vm439_vm10, %v1181_v61, %v1182_v60 }
 0x22a   : > { %v815_v5 = vpop.permute.xlu0 %814  ;;  %v782_v6 = vpop.permute.xlu1 %781  ;;  %v787_v8 = vsel %vm1314_vm1, %v783_v4, 0.0 }
 0x22b   : > { %771 = vst [vmem:[#allocation3 + $0x28] sm:$0x33] %v1104_v3  ;;  %v784_v7 = vsel %vm439_vm10, %v1182_v60, %v782_v6  ;;  %v818_v15 = vrot.slane %v815_v5, 4 }
 0x22c   : > { %v788_v9 = vsel %vm1318_vm2, %v784_v7, 0.0 }
 0x22d   : > { %v1105_v10 = vpack.c.bf16 %v788_v9, %v787_v8 }
 0x22e   : > { %v1185_v11 = vpop.permute.xlu0 %1184  ;;  %v817_v12 = vpop.permute.xlu1 %816  ;;  %v1205_v13 = vld [vmem:[#allocation3 + $0x4] ss:$8 sps:$4 sm:$0xff]   ;;  %v1207_v14 = vld [vmem:[#allocation3] ss:$8 sps:$4 sm:$0xff]  }
 0x22f   : > { %797 = vst [vmem:[#allocation3 + $0x30] sm:$0x33] %v1105_v10  ;;  %v1187_v16 = vunpack.i.h.bf16 %v1185_v11  ;;  %v1186_v17 = vunpack.i.l.bf16 %v1185_v11  ;;  %v819_v18 = vrot.slane %v817_v12, 4  ;;  %919 = vmatprep.subr.bf16.mxu1 %v1205_v13 }
 0x230   : > { %920 = vmatpush1.bf16.msra.mxu1 %v1207_v14 }
 0x231   : > { %v820_v20 = vsel %vm324_vm6, %v818_v15, %v819_v18  ;;  %v835_v30 = vsel %vm493_vm12, %v1186_v17, %v1187_v16  ;;  %921 = vmatprep.subr.bf16.mxu1 %v1208_v19 }
 0x232   : > { %v821_v31 = vsel %vm478_vm11, %v815_v5, %v820_v20  ;;  %v834_v21 = vpop.permute.xlu1 %833  ;;  %v839_v24 = vsel %vm1328_vm3, %v835_v30, 0.0  ;;  %v1211_v26 = vld [vmem:[#allocation3 + $0x24] ss:$8 sps:$4 sm:$0xff]   ;;  %v1213_v28 = vld [vmem:[#allocation3 + $0x20] ss:$8 sps:$4 sm:$0xff]  }
 0x233   : > { %823 = vst [vmem:[#allocation3 + $0x38] sm:$0x33] %v821_v31  ;;  %v836_v22 = vsel %vm493_vm12, %v1187_v16, %v834_v21 }
 0x234   : > { %v840_v25 = vsel %vm1332_vm5, %v836_v22, 0.0  ;;  %922 = vmatpush1.bf16.msra.mxu1 %v1210_v23 }
 0x235   : > { %v1108_v27 = vpack.c.bf16 %v840_v25, %v839_v24  ;;  %923 = vmatprep.subr.bf16.mxu1 %v1211_v26 }
 0x237   : > { %849 = vst [vmem:[#allocation3 + $0x40] sm:$0x33] %v1108_v27 }
 0x238   : > { %924 = vmatpush1.bf16.msra.mxu1 %v1213_v28 }
 0x23a   : > { %v1214_v29 = vld [vmem:[#allocation3 + $0x34] ss:$8 sps:$4 sm:$0xff]   ;;  %v1216_v32 = vld [vmem:[#allocation3 + $0x30] ss:$8 sps:$4 sm:$0xff]  }
 0x23b   : > { %925 = vmatprep.subr.bf16.mxu1 %v1214_v29 }
 0x23c   : > { %926 = vmatpush1.bf16.msra.mxu1 %v1216_v32 }
 0x23e   : > { %v859_v33 = vld [vmem:[#allocation3 + $0x40] sm:$0xff] }
 0x23f   : > { %v1080_v34 = vcombine.high %v859_v33, %v859_v33  ;;  %v1079_v35 = vcombine.low %v859_v33, %v859_v33  ;;  %v863_v36 = vpop.permute.xlu0 %862 }
 0x241   : > { %1081 = vmatprep.subr.msk.bf16.mxu1 %vm324_vm6, %v1080_v34  ;;  %v914_v39 = vsel %vm324_vm6, %v1079_v35, 0 }
 0x242   : > { %928 = vmatpush1.bf16.msra.mxu1 %v914_v39 }
 0x245   : > { %1082 = vmatmul.mubr.msk.bf16.vlgmr.msra.gmra.mrb[0].mxu1 %vm569_vm13, %v850_v42 }
 0x318   : > { %v953_v37 = vpop.f32.mrb[0].mxu1 }
 0x319   : > { %v954_v38 = vadd.f32 %v953_v37, %v863_v36  ;;  %v955_v40 = vpop.f32.mrb[1].mxu1 }
 0x31a   : > { %v956_v41 = vadd.f32 %v955_v40, %v863_v36  ;;  %v957_v43 = vpop.f32.mrb[2].mxu1 }
 0x31b   : > { %v964_v44 = vadd.f32 %v954_v38, %v1284_v1  ;;  %v958_v45 = vpop.f32.mrb[3].mxu1 }
 0x31c   : > { %v965_v46 = vadd.f32 %v956_v41, %v1289_v2 }
 0x31d   : > { %v966_v47 = vmax.f32 %v964_v44, 0.0 }
 0x31e   : > { %v967_v48 = vmax.f32 %v965_v46, 0.0 }
 0x320   : > { %v970_v49 = vcombine.low %v966_v47, %v967_v48 }
 0x322   : > { %972 = vst [vmem:[%s224_s17] sm:$0xff] %v970_v49 }
 0x323 PF: > { %s15_s18 = sadd.s32 1, %s1226_s18  }
 0x324   : > { %p12_p4 = scmp.ge.s32.totalorder %s15_s18, 4  }
 0x326   :  { %14 = sbr.rel (!%p12_p4) target bundleno = 1 (0x1), region = 70 }

</bundles_post_ra>
